<compile_context>
chip_gen: v5e
topology: v5e:2x2
jax: 0.10.0
libtpu: 0.0.40
codegen_flags: <defaults>
</compile_context>

<pallas_src>
import jax
import jax.numpy as jnp
from jax.experimental import pallas as pl
from jax.experimental.pallas import tpu as pltpu


def make_attention_kernel(batch: int, seq: int, heads: int, head_ch: int):
    """Multi-head self-attention over a (B*N, D) activation slab, fully resident in VMEM."""
    inner = heads * head_ch

    def kernel(x_ref, wqkv_ref, wo_ref, bo_ref, mask_ref, o_ref):
        xf = x_ref[...]                                   # (B*N, D) f32
        mask = mask_ref[...]                              # (B*N, B*N) additive mask (0 / -1e30)

        # Single lane-dense fused QKV projection: (B*N, D) @ (D, 3*inner).
        # Attention scale is already folded into the Q columns on the host.
        qkv = jnp.dot(xf, wqkv_ref[...], preferred_element_type=jnp.float32)   # (B*N, 3*inner)

        outs = []
        for h in range(heads):                            # static unroll; heads is small
            q_h = qkv[:, h * head_ch:(h + 1) * head_ch]                          # (B*N, dh)
            k_h = qkv[:, inner + h * head_ch:inner + (h + 1) * head_ch]          # (B*N, dh)
            v_h = qkv[:, 2 * inner + h * head_ch:2 * inner + (h + 1) * head_ch]  # (B*N, dh)

            # Packed (B*N, B*N) scores; the block-diagonal additive mask keeps
            # attention within each batch element.
            dots = jnp.dot(q_h, k_h.T, preferred_element_type=jnp.float32) + mask
            dots = dots - jnp.max(dots, axis=-1, keepdims=True)
            p = jnp.exp(dots)
            row_sum = jnp.sum(p, axis=-1, keepdims=True)
            # Deferred softmax normalization: normalize the small (B*N, dh) result
            # instead of dividing the whole (B*N, B*N) probability matrix.
            o_h = jnp.dot(p, v_h, preferred_element_type=jnp.float32)
            o_h = o_h * pl.reciprocal(row_sum, approx=True)
            # TODO(synk): attention/output dropout omitted (p=0.0 / eval -> identity)
            outs.append(o_h)

        # Concatenate heads along lanes -> single lane-dense output projection.
        o_cat = jnp.concatenate(outs, axis=-1)            # (B*N, inner)
        out = jnp.dot(o_cat, wo_ref[...], preferred_element_type=jnp.float32)    # (B*N, D)
        o_ref[...] = (out + bo_ref[...]).astype(o_ref.dtype)

    return kernel


def attention_forward(x, w_qkv_f, w_o, b_o, mask, heads, head_ch):
    """x: (B, N, D) -> (B, N, D). Single pallas_call, whole problem in one VMEM block."""
    B, N, D = x.shape
    bn = B * N
    kernel = make_attention_kernel(B, N, heads, head_ch)
    vmem = pltpu.MemorySpace.VMEM
    out = pl.pallas_call(
        kernel,
        out_shape=jax.ShapeDtypeStruct((bn, D), jnp.float32),
        in_specs=[pl.BlockSpec(memory_space=vmem)] * 5,
        out_specs=pl.BlockSpec(memory_space=vmem),
        # No grid: activations (~2 KiB) + weights (~13 KiB) + mask fit trivially in VMEM.
    )(x.reshape(bn, D), w_qkv_f, w_o, b_o, mask)
    return out.reshape(B, N, D)


def prepare_params(w_qkv, w_out, b_out, heads, head_ch, batch, seq):
    """PyTorch-convention weights -> lane-dense kernel operands.

      w_qkv : (3*inner, hid) = nn.Linear(hid, 3*inner, bias=False).weight
      w_out : (hid, inner)   = to_out[0].weight
      b_out : (hid,)         = to_out[0].bias
    """
    inner = heads * head_ch
    hid = w_qkv.shape[1]
    scale = head_ch ** -0.5

    # nn.Linear computes y = x @ W.T  ->  fused kernel weight is W.T : (hid, 3*inner).
    # Column layout [q heads..., k heads..., v heads...] matches chunk(3, dim=-1) +
    # 'b n (h d) -> b h n d' in the reference, so per-head slices are contiguous lanes.
    w_qkv_f = jnp.asarray(w_qkv, jnp.float32).T
    w_qkv_f = w_qkv_f.at[:, :inner].multiply(scale)       # fold attention scale into Q

    w_o = jnp.asarray(w_out, jnp.float32).T               # (inner, hid)
    b_o = jnp.asarray(b_out, jnp.float32).reshape(1, hid)

    # Block-diagonal additive mask over the packed (B*N, B*N) score matrix:
    # 0 where rows/cols belong to the same batch element, -1e30 otherwise.
    bn = batch * seq
    bidx = jnp.arange(bn, dtype=jnp.int32) // seq
    mask = jnp.where(bidx[:, None] == bidx[None, :], 0.0, -1e30).astype(jnp.float32)
    return w_qkv_f, w_o, b_o, mask


def attention_reference(x, w_qkv, w_out, b_out, heads, head_ch):
    """Pure-JAX mirror of the PyTorch forward (validation only)."""
    B, N, D = x.shape
    inner = heads * head_ch
    scale = head_ch ** -0.5
    qkv = jnp.einsum('bnd,od->bno', x, w_qkv, precision='highest')
    q, k, v = jnp.split(qkv, 3, axis=-1)

    def to_heads(t):
        return jnp.transpose(t.reshape(B, N, heads, head_ch), (0, 2, 1, 3))

    q, k, v = to_heads(q), to_heads(k), to_heads(v)
    dots = jnp.einsum('bhqd,bhkd->bhqk', q, k, precision='highest') * scale
    attn = jax.nn.softmax(dots, axis=-1)
    out = jnp.einsum('bhqk,bhkd->bhqd', attn, v, precision='highest')
    out = jnp.transpose(out, (0, 2, 1, 3)).reshape(B, N, inner)
    return jnp.einsum('bni,oi->bno', out, w_out, precision='highest') + b_out


if __name__ == "__main__":
    # Attention(hid_channels=32, heads=4, head_channels=8, dropout=0.0)
    B, N, HID, HEADS, HEAD_CH = 2, 8, 32, 4, 8

    key = jax.random.PRNGKey(0)
    kx, k1, k2, k3 = jax.random.split(key, 4)
    x = jax.random.normal(kx, (B, N, HID), jnp.float32)
    w_qkv = jax.random.normal(k1, (3 * HEADS * HEAD_CH, HID), jnp.float32) * 0.05
    w_out = jax.random.normal(k2, (HID, HEADS * HEAD_CH), jnp.float32) * 0.05
    b_out = jax.random.normal(k3, (HID,), jnp.float32) * 0.01

    params = prepare_params(w_qkv, w_out, b_out, HEADS, HEAD_CH, B, N)
    out = attention_forward(x, *params, HEADS, HEAD_CH)
    out = jax.block_until_ready(out)

    assert out.shape == (B, N, HID) and out.dtype == jnp.float32
    ref = attention_reference(x, w_qkv, w_out, b_out, HEADS, HEAD_CH)
    err = float(jnp.max(jnp.abs(out - ref)))
    assert jnp.allclose(out, ref, atol=1e-2, rtol=1e-2), err
    print("KERNEL_OK")
</pallas_src>

<mosaic_0001>
module attributes {stable_mosaic.version = 11 : i64} {
  func.func @kernel(%arg0: memref<16x32xf32, #tpu.memory_space<vmem>>, %arg1: memref<32x96xf32, #tpu.memory_space<vmem>>, %arg2: memref<32x32xf32, #tpu.memory_space<vmem>>, %arg3: memref<1x32xf32, #tpu.memory_space<vmem>>, %arg4: memref<16x16xf32, #tpu.memory_space<vmem>>, %arg5: memref<16x32xf32, #tpu.memory_space<vmem>>) attributes {dimension_semantics = [], scalar_prefetch = 0 : i64, scratch_operands = 0 : i64, tpu.core_type = #tpu.core_type<tc>} {
    %c0 = arith.constant 0 : index
    %c0_0 = arith.constant 0 : index
    %0 = vector.load %arg0[%c0, %c0_0] : memref<16x32xf32, #tpu.memory_space<vmem>>, vector<16x32xf32>
    %c0_1 = arith.constant 0 : index
    %c0_2 = arith.constant 0 : index
    %1 = vector.load %arg4[%c0_1, %c0_2] : memref<16x16xf32, #tpu.memory_space<vmem>>, vector<16x16xf32>
    %c0_3 = arith.constant 0 : index
    %c0_4 = arith.constant 0 : index
    %2 = vector.load %arg1[%c0_3, %c0_4] : memref<32x96xf32, #tpu.memory_space<vmem>>, vector<32x96xf32>
    %cst = arith.constant dense<0.000000e+00> : vector<16x96xf32>
    %3 = tpu.matmul %0, %2, %cst {dimension_numbers = #tpu.dot_dimension_numbers<[1], [0], [0], [1], [0, 0, 1, 1], [], []>} : vector<16x32xf32>, vector<32x96xf32>, vector<16x96xf32> -> vector<16x96xf32>
    %4 = vector.extract_strided_slice %3 {offsets = [0, 0], sizes = [16, 8], strides = [1, 1]} : vector<16x96xf32> to vector<16x8xf32>
    %5 = vector.extract_strided_slice %3 {offsets = [0, 32], sizes = [16, 8], strides = [1, 1]} : vector<16x96xf32> to vector<16x8xf32>
    %6 = vector.extract_strided_slice %3 {offsets = [0, 64], sizes = [16, 8], strides = [1, 1]} : vector<16x96xf32> to vector<16x8xf32>
    %7 = tpu.transpose %5, [1, 0] : vector<16x8xf32> -> vector<8x16xf32>
    %cst_5 = arith.constant dense<0.000000e+00> : vector<16x16xf32>
    %8 = tpu.matmul %4, %7, %cst_5 {dimension_numbers = #tpu.dot_dimension_numbers<[1], [0], [0], [1], [0, 0, 1, 1], [], []>} : vector<16x8xf32>, vector<8x16xf32>, vector<16x16xf32> -> vector<16x16xf32>
    %9 = arith.addf %8, %1 : vector<16x16xf32>
    %cst_6 = arith.constant dense<0xFF800000> : vector<16xf32>
    %10 = vector.multi_reduction <maximumf>, %9, %cst_6 [1] : vector<16x16xf32> to vector<16xf32>
    %11 = vector.shape_cast %10 : vector<16xf32> to vector<16x1xf32>
    %12 = vector.broadcast %11 : vector<16x1xf32> to vector<16x16xf32>
    %13 = arith.subf %9, %12 : vector<16x16xf32>
    %14 = math.exp %13 : vector<16x16xf32>
    %cst_7 = arith.constant dense<0.000000e+00> : vector<16xf32>
    %15 = vector.multi_reduction <add>, %14, %cst_7 [1] : vector<16x16xf32> to vector<16xf32>
    %16 = vector.shape_cast %15 : vector<16xf32> to vector<16x1xf32>
    %cst_8 = arith.constant dense<0.000000e+00> : vector<16x8xf32>
    %17 = tpu.matmul %14, %6, %cst_8 {dimension_numbers = #tpu.dot_dimension_numbers<[1], [0], [0], [1], [0, 0, 1, 1], [], []>} : vector<16x16xf32>, vector<16x8xf32>, vector<16x8xf32> -> vector<16x8xf32>
    %18 = tpu.reciprocal %16 {approx = true} : vector<16x1xf32> -> vector<16x1xf32>
    %19 = vector.broadcast %18 : vector<16x1xf32> to vector<16x8xf32>
    %20 = arith.mulf %17, %19 : vector<16x8xf32>
    %21 = vector.extract_strided_slice %3 {offsets = [0, 8], sizes = [16, 8], strides = [1, 1]} : vector<16x96xf32> to vector<16x8xf32>
    %22 = vector.extract_strided_slice %3 {offsets = [0, 40], sizes = [16, 8], strides = [1, 1]} : vector<16x96xf32> to vector<16x8xf32>
    %23 = vector.extract_strided_slice %3 {offsets = [0, 72], sizes = [16, 8], strides = [1, 1]} : vector<16x96xf32> to vector<16x8xf32>
    %24 = tpu.transpose %22, [1, 0] : vector<16x8xf32> -> vector<8x16xf32>
    %cst_9 = arith.constant dense<0.000000e+00> : vector<16x16xf32>
    %25 = tpu.matmul %21, %24, %cst_9 {dimension_numbers = #tpu.dot_dimension_numbers<[1], [0], [0], [1], [0, 0, 1, 1], [], []>} : vector<16x8xf32>, vector<8x16xf32>, vector<16x16xf32> -> vector<16x16xf32>
    %26 = arith.addf %25, %1 : vector<16x16xf32>
    %cst_10 = arith.constant dense<0xFF800000> : vector<16xf32>
    %27 = vector.multi_reduction <maximumf>, %26, %cst_10 [1] : vector<16x16xf32> to vector<16xf32>
    %28 = vector.shape_cast %27 : vector<16xf32> to vector<16x1xf32>
    %29 = vector.broadcast %28 : vector<16x1xf32> to vector<16x16xf32>
    %30 = arith.subf %26, %29 : vector<16x16xf32>
    %31 = math.exp %30 : vector<16x16xf32>
    %cst_11 = arith.constant dense<0.000000e+00> : vector<16xf32>
    %32 = vector.multi_reduction <add>, %31, %cst_11 [1] : vector<16x16xf32> to vector<16xf32>
    %33 = vector.shape_cast %32 : vector<16xf32> to vector<16x1xf32>
    %cst_12 = arith.constant dense<0.000000e+00> : vector<16x8xf32>
    %34 = tpu.matmul %31, %23, %cst_12 {dimension_numbers = #tpu.dot_dimension_numbers<[1], [0], [0], [1], [0, 0, 1, 1], [], []>} : vector<16x16xf32>, vector<16x8xf32>, vector<16x8xf32> -> vector<16x8xf32>
    %35 = tpu.reciprocal %33 {approx = true} : vector<16x1xf32> -> vector<16x1xf32>
    %36 = vector.broadcast %35 : vector<16x1xf32> to vector<16x8xf32>
    %37 = arith.mulf %34, %36 : vector<16x8xf32>
    %38 = vector.extract_strided_slice %3 {offsets = [0, 16], sizes = [16, 8], strides = [1, 1]} : vector<16x96xf32> to vector<16x8xf32>
    %39 = vector.extract_strided_slice %3 {offsets = [0, 48], sizes = [16, 8], strides = [1, 1]} : vector<16x96xf32> to vector<16x8xf32>
    %40 = vector.extract_strided_slice %3 {offsets = [0, 80], sizes = [16, 8], strides = [1, 1]} : vector<16x96xf32> to vector<16x8xf32>
    %41 = tpu.transpose %39, [1, 0] : vector<16x8xf32> -> vector<8x16xf32>
    %cst_13 = arith.constant dense<0.000000e+00> : vector<16x16xf32>
    %42 = tpu.matmul %38, %41, %cst_13 {dimension_numbers = #tpu.dot_dimension_numbers<[1], [0], [0], [1], [0, 0, 1, 1], [], []>} : vector<16x8xf32>, vector<8x16xf32>, vector<16x16xf32> -> vector<16x16xf32>
    %43 = arith.addf %42, %1 : vector<16x16xf32>
    %cst_14 = arith.constant dense<0xFF800000> : vector<16xf32>
    %44 = vector.multi_reduction <maximumf>, %43, %cst_14 [1] : vector<16x16xf32> to vector<16xf32>
    %45 = vector.shape_cast %44 : vector<16xf32> to vector<16x1xf32>
    %46 = vector.broadcast %45 : vector<16x1xf32> to vector<16x16xf32>
    %47 = arith.subf %43, %46 : vector<16x16xf32>
    %48 = math.exp %47 : vector<16x16xf32>
    %cst_15 = arith.constant dense<0.000000e+00> : vector<16xf32>
    %49 = vector.multi_reduction <add>, %48, %cst_15 [1] : vector<16x16xf32> to vector<16xf32>
    %50 = vector.shape_cast %49 : vector<16xf32> to vector<16x1xf32>
    %cst_16 = arith.constant dense<0.000000e+00> : vector<16x8xf32>
    %51 = tpu.matmul %48, %40, %cst_16 {dimension_numbers = #tpu.dot_dimension_numbers<[1], [0], [0], [1], [0, 0, 1, 1], [], []>} : vector<16x16xf32>, vector<16x8xf32>, vector<16x8xf32> -> vector<16x8xf32>
    %52 = tpu.reciprocal %50 {approx = true} : vector<16x1xf32> -> vector<16x1xf32>
    %53 = vector.broadcast %52 : vector<16x1xf32> to vector<16x8xf32>
    %54 = arith.mulf %51, %53 : vector<16x8xf32>
    %55 = vector.extract_strided_slice %3 {offsets = [0, 24], sizes = [16, 8], strides = [1, 1]} : vector<16x96xf32> to vector<16x8xf32>
    %56 = vector.extract_strided_slice %3 {offsets = [0, 56], sizes = [16, 8], strides = [1, 1]} : vector<16x96xf32> to vector<16x8xf32>
    %57 = vector.extract_strided_slice %3 {offsets = [0, 88], sizes = [16, 8], strides = [1, 1]} : vector<16x96xf32> to vector<16x8xf32>
    %58 = tpu.transpose %56, [1, 0] : vector<16x8xf32> -> vector<8x16xf32>
    %cst_17 = arith.constant dense<0.000000e+00> : vector<16x16xf32>
    %59 = tpu.matmul %55, %58, %cst_17 {dimension_numbers = #tpu.dot_dimension_numbers<[1], [0], [0], [1], [0, 0, 1, 1], [], []>} : vector<16x8xf32>, vector<8x16xf32>, vector<16x16xf32> -> vector<16x16xf32>
    %60 = arith.addf %59, %1 : vector<16x16xf32>
    %cst_18 = arith.constant dense<0xFF800000> : vector<16xf32>
    %61 = vector.multi_reduction <maximumf>, %60, %cst_18 [1] : vector<16x16xf32> to vector<16xf32>
    %62 = vector.shape_cast %61 : vector<16xf32> to vector<16x1xf32>
    %63 = vector.broadcast %62 : vector<16x1xf32> to vector<16x16xf32>
    %64 = arith.subf %60, %63 : vector<16x16xf32>
    %65 = math.exp %64 : vector<16x16xf32>
    %cst_19 = arith.constant dense<0.000000e+00> : vector<16xf32>
    %66 = vector.multi_reduction <add>, %65, %cst_19 [1] : vector<16x16xf32> to vector<16xf32>
    %67 = vector.shape_cast %66 : vector<16xf32> to vector<16x1xf32>
    %cst_20 = arith.constant dense<0.000000e+00> : vector<16x8xf32>
    %68 = tpu.matmul %65, %57, %cst_20 {dimension_numbers = #tpu.dot_dimension_numbers<[1], [0], [0], [1], [0, 0, 1, 1], [], []>} : vector<16x16xf32>, vector<16x8xf32>, vector<16x8xf32> -> vector<16x8xf32>
    %69 = tpu.reciprocal %67 {approx = true} : vector<16x1xf32> -> vector<16x1xf32>
    %70 = vector.broadcast %69 : vector<16x1xf32> to vector<16x8xf32>
    %71 = arith.mulf %68, %70 : vector<16x8xf32>
    %72 = tpu.concatenate %20, %37, %54, %71 in 1 : vector<16x8xf32>, vector<16x8xf32>, vector<16x8xf32>, vector<16x8xf32> -> vector<16x32xf32>
    %c0_21 = arith.constant 0 : index
    %c0_22 = arith.constant 0 : index
    %73 = vector.load %arg2[%c0_21, %c0_22] : memref<32x32xf32, #tpu.memory_space<vmem>>, vector<32x32xf32>
    %cst_23 = arith.constant dense<0.000000e+00> : vector<16x32xf32>
    %74 = tpu.matmul %72, %73, %cst_23 {dimension_numbers = #tpu.dot_dimension_numbers<[1], [0], [0], [1], [0, 0, 1, 1], [], []>} : vector<16x32xf32>, vector<32x32xf32>, vector<16x32xf32> -> vector<16x32xf32>
    %c0_24 = arith.constant 0 : index
    %c0_25 = arith.constant 0 : index
    %75 = vector.load %arg3[%c0_24, %c0_25] : memref<1x32xf32, #tpu.memory_space<vmem>>, vector<1x32xf32>
    %76 = vector.broadcast %75 : vector<1x32xf32> to vector<16x32xf32>
    %77 = arith.addf %74, %76 : vector<16x32xf32>
    %c0_26 = arith.constant 0 : index
    %c0_27 = arith.constant 0 : index
    %78 = vector.load %arg5[%c0_26, %c0_27] : memref<16x32xf32, #tpu.memory_space<vmem>>, vector<16x32xf32>
    tpu.vector_store %arg5[%c0_26, %c0_27], %77 {strides = array<i32>} : memref<16x32xf32, #tpu.memory_space<vmem>>, vector<16x32xf32>,
    return
  }
}

</mosaic_0001>

<bundles_post_ra>
// kernel: tpu_custom_call.1
= control target key start
LH: loop header
LB: loop body
LE: loop exit
PB: predicated region body
PF: predicated region fallthrough
CT: control target
= control target key end

     0   :  { %10 = vsyncpa [#allocation3], 0  ;;  %s1003_s0 = inlined_call_operand.hbm [shape: f32[16,32], index: 0, kind: input, shape index: {}]   ;;  %s1004_s1 = inlined_call_operand.hbm [shape: f32[32,96], index: 1, kind: input, shape index: {}]   ;;  %s1005_s2 = inlined_call_operand.hbm [shape: f32[32,32], index: 2, kind: input, shape index: {}]   ;;  %s1006_s3 = inlined_call_operand.vmem [shape: f32[1,32], index: 3, kind: input, shape index: {}]   ;;  %s1007_s4 = inlined_call_operand.hbm [shape: f32[16,16], index: 4, kind: input, shape index: {}]   ;;  %s1008_s5 = inlined_call_operand.hbm [shape: f32[16,32], index: 5, kind: output, shape index: {}]  }
   0x1   :  { %11 = vsyncpa [#allocation6], 0 }
   0x2   :  { %12 = vsyncpa [#allocation9], 0 }
   0x3   :  { %13 = vsyncpa [#allocation4], 0  ;;  %s31_s20 = sshll.u32 %s1004_s1, 4  ;;  %s832_s21 = smov [#allocation5]   ;;  %s32_s20 = int_to_ptr.hbm [resolvable:$true] %s31_s20 }
   0x4   :  { %s33_s22 = sshll.u32 %s832_s21, 4  ;;  %s18_s25 = sshll.u32 %s1003_s0, 4  ;;  %s34_s22 = int_to_ptr.vmem [resolvable:$true] %s33_s22  ;;  %s19_s25 = int_to_ptr.hbm [resolvable:$true] %s18_s25 }
   0x5   :  { %s833_s26 = smov 128   ;;  %s834_s27 = smov 8  }
   0x6   :  { %39 = dma.hbm_to_vmem [thread:$0]  %s32_s20, 512, %s34_s22, [#allocation6], %s833_s26, %s833_s26, %s834_s27  }
   0x7   :  { %s835_s28 = smov [#allocation2]   ;;  %s44_s1 = sshll.u32 %s1005_s2, 4  ;;  %s45_s1 = int_to_ptr.hbm [resolvable:$true] %s44_s1 }
   0x8   :  { %s20_s29 = sshll.u32 %s835_s28, 4  ;;  %s59_s8 = sshll.u32 %s1007_s4, 4  ;;  %s21_s29 = int_to_ptr.vmem [resolvable:$true] %s20_s29  ;;  %s60_s8 = int_to_ptr.hbm [resolvable:$true] %s59_s8 }
   0x9   :  { %26 = dma.hbm_to_vmem [thread:$0]  %s19_s25, 256, %s21_s29, [#allocation3], %s833_s26, %s833_s26, %s834_s27  }
   0xa   :  { %s836_s9 = smov [#allocation7]   ;;  %s837_s11 = smov [#allocation8]  }
   0xb   :  { %s46_s10 = sshll.u32 %s836_s9, 4  ;;  %s61_s2 = sshll.u32 %s837_s11, 4  ;;  %s47_s10 = int_to_ptr.vmem [resolvable:$true] %s46_s10  ;;  %s62_s2 = int_to_ptr.vmem [resolvable:$true] %s61_s2 }
   0xc   :  { %52 = dma.hbm_to_vmem [thread:$0]  %s45_s1, 512, %s47_s10, [#allocation6], %s833_s26, %s833_s26, %s834_s27  }
   0xd   :  { %67 = dma.hbm_to_vmem [thread:$0]  %s60_s8, 256, %s62_s2, [#allocation9], %s833_s26, %s833_s26, %s834_s27  }
   0xe   :  { %824 = dma.done.wait [#allocation3], 256  }
   0xf   :  { %825 = vsyncadd [#allocation3], 4294967040 }
  0x10   :  { %826 = dma.done.wait [#allocation6], 1024  }
  0x11   :  { %827 = vsyncadd [#allocation6], 4294966272 }
  0x12   :  { %828 = dma.done.wait [#allocation9], 256  }
  0x13   :  { %829 = vsyncadd [#allocation9], 4294967040  ;;  %v91_v0 = vld [vmem:[#allocation5 + $0x18] sm:$0xff]  ;;  %v90_v1 = vld [vmem:[#allocation5 + $0x10] sm:$0xff]  ;;  %vm92_vm0 = vcmask 261120   ;;  %s838_s4 = smov 88  }
  0x14   :  { %111 = vmatpush.msra.mxu0 %v91_v0  ;;  %625 = vmatpush.msra.mxu1 %v91_v0  ;;  %v89_v2 = vld [vmem:[#allocation5 + $0x8] sm:$0xff]  ;;  %v88_v3 = vld [vmem:[#allocation5] sm:$0xff]  ;;  %v84_v4 = vld [vmem:[#allocation2] sm:$0xff]  ;;  %s839_s12 = smov 96   ;;  %s840_s13 = smov 120   ;;  %vm128_vm1 = vcmask 64512  }
  0x15   :  { %v85_v5 = vld [vmem:[#allocation2 + $0x8] sm:$0xff]  ;;  %s841_s14 = smov 72   ;;  %s842_s15 = smov 80   ;;  %v920_v16 = vld [vmem:[#allocation8] sm:$0xff]  ;;  %vm160_vm2 = vcmask 130048   ;;  %v924_v20 = vld [vmem:[#allocation8 + $0x8] sm:$0xff] }
  0x16   :  { %112 = vmatpush.msra.mxu0 %v90_v1  ;;  %626 = vmatpush.msra.mxu1 %v90_v1  ;;  %s843_s16 = smov 104   ;;  %s844_s17 = smov 112   ;;  %vm534_vm3 = vcmask 195584  }
  0x17   :  { %s845_s18 = smov 56   ;;  %s846_s19 = smov 64  }
  0x18   :  { %113 = vmatpush.msra.mxu0 %v89_v2  ;;  %627 = vmatpush.msra.mxu1 %v89_v2  ;;  %s847_s20 = smov 48   ;;  %s848_s21 = smov 40  }
  0x19   :  { %s849_s22 = smov 16   ;;  %s850_s23 = smov 24  }
  0x1a   :  { %114 = vmatpush.msra.mxu0 %v88_v3  ;;  %628 = vmatpush.msra.mxu1 %v88_v3  ;;  %s851_s28 = smov [#allocation10]   ;;  %s582_s1 = sshll.u32 %s1008_s5, 4  ;;  %s583_s1 = int_to_ptr.hbm [resolvable:$true] %s582_s1 }
  0x1b   :  { %597 = vmatmul.msk.f32.vlgmr.msra.gmra.mxu0 %vm92_vm0, %v84_v4  ;;  %598 = vmatmul.msk.f32.vlgmr.msra.gmra.mxu1 %vm92_vm0, %v85_v5  ;;  %s580_s29 = sshll.u32 %s851_s28, 4  ;;  %s581_s29 = int_to_ptr.vmem [resolvable:$true] %s580_s29 }
  0x98   :  { %v119_v6 = vpop.f32.mrf.mxu1  ;;  %v116_v7 = vpop.f32.mrf.mxu0 }
  0x99   :  { %224 = vrot.lane.b32.xlu2 %v119_v6, %s838_s4  ;;  %126 = vrot.lane.b32.xlu0 %v119_v6, %s839_s12  ;;  %v910_v8 = vpack.i.bf16 %v116_v7, %v119_v6 }
  0xa1   :  { %222 = vrot.lane.b32.xlu2 %v116_v7, %s838_s4  ;;  %124 = vrot.lane.b32.xlu0 %v116_v7, %s839_s12 }
  0xa9   :  { %220 = vrot.lane.b32.xlu2 %v119_v6, %s840_s13  ;;  %218 = vrot.lane.b32.xlu0 %v116_v7, %s840_s13 }
  0xb1   :  { %414 = vrot.lane.b32.xlu2 %v116_v7, %s841_s14  ;;  %416 = vrot.lane.b32.xlu0 %v119_v6, %s841_s14 }
  0xb9   :  { %320 = vrot.lane.b32.xlu2 %v119_v6, %s842_s15  ;;  %410 = vrot.lane.b32.xlu0 %v116_v7, %s843_s16 }
  0xc1   :  { %314 = vrot.lane.b32.xlu2 %v116_v7, %s844_s17  ;;  %412 = vrot.lane.b32.xlu0 %v119_v6, %s843_s16 }
  0xc9   :  { %657 = vrot.lane.b32.xlu2 %v910_v8, %s845_s18 }
  0xf3   :  { %v225_v9 = vpop.permute.xlu2 %224 }
  0xfb   :  { %v223_v10 = vpop.permute.xlu2 %222 }
 0x103   :  { %v913_v11 = vpop.permute.xlu2 %220 }
 0x10b   :  { %v127_v12 = vpop.permute.xlu0 %126  ;;  %v415_v13 = vpop.permute.xlu2 %414 }
 0x10c   :  { %599 = vmatpush.xpose.msk.msrb.mxu1 %vm128_vm1, %v127_v12 }
 0x113   :  { %v321_v14 = vpop.permute.xlu2 %320  ;;  %v125_v15 = vpop.permute.xlu0 %124 }
 0x114   :  { %600 = vmatpush.xpose.msk.msrb.mxu1 %vm128_vm1, %v125_v15  ;;  %611 = vmatpush.xpose.msk.msrb.mxu0 %vm128_vm1, %v321_v14 }
 0x117   :  { %601 = vmatmul.msk.f32.vlgmr.msrb.gmra.mxu1 %vm128_vm1, %v116_v7 }
 0x11b   :  { %v219_v24 = vpop.permute.xlu0 %218  ;;  %v315_v32 = vpop.permute.xlu2 %314 }
 0x11f   :  { %602 = vmatmul.msk.f32.gmra.mxu1 %vm128_vm1, %v119_v6 }
 0x123   :  { %v417_v25 = vpop.permute.xlu0 %416  ;;  %v658_v37 = vpop.permute.xlu2 %657 }
 0x124   :  { %v659_v41 = vunpack.i.l.bf16 %v658_v37  ;;  %v660_v42 = vunpack.i.h.bf16 %v658_v37 }
 0x12b   :  { %v411_v26 = vpop.permute.xlu0 %410 }
 0x133   :  { %v413_v27 = vpop.permute.xlu0 %412 }
 0x194   :  { %v154_v17 = vpop.f32.mrf.mxu1 }
 0x195   :  { %v155_v18 = vadd.f32 %v154_v17, %v920_v16 }
 0x197   :  { %v161_v19 = vsel %vm160_vm2, %v155_v18, -inf }
 0x198   :  { %162 = vmax.xlane.f32.xlu0 %v161_v19 }
 0x19c   :  { %v157_v21 = vpop.f32.mrf.mxu1 }
 0x19d   :  { %v158_v22 = vadd.f32 %v157_v21, %v924_v20 }
 0x19f   :  { %v164_v23 = vsel %vm160_vm2, %v158_v22, -inf }
 0x1a0   :  { %165 = vmax.xlane.f32.xlu1 %v164_v23 }
 0x1b9   :  { %652 = vrot.lane.b32.xlu1 %v910_v8, %s846_s19 }
 0x1c1   :  { %318 = vrot.lane.b32.xlu1 %v116_v7, %s842_s15 }
 0x1c9   :  { %316 = vrot.lane.b32.xlu1 %v119_v6, %s844_s17 }
 0x20b   :  { %v163_v28 = vpop.xlane.xlu0 %162 }
 0x20c   :  { %v167_v30 = vsub.f32 %v155_v18, %v163_v28 }
 0x20e   :  { %v169_v33 = vmul.f32 1.442695, %v167_v30 }
 0x210   :  { %672 = vpow2.f32 %v169_v33 }
 0x213   :  { %v166_v29 = vpop.xlane.xlu1 %165 }
 0x214   :  { %v168_v31 = vsub.f32 %v158_v22, %v166_v29 }
 0x216   :  { %v171_v34 = vmul.f32 1.442695, %v168_v31  ;;  %v931_v39 = vpop.eup %672 }
 0x218   :  { %674 = vpow2.f32 %v171_v34  ;;  %v173_v34 = vsel %vm160_vm2, %v931_v39, 0.0 }
 0x21e   :  { %v933_v40 = vpop.eup %674 }
 0x22b   :  { %v653_v35 = vpop.permute.xlu1 %652 }
 0x22c   :  { %v654_v36 = vunpack.i.l.bf16 %v653_v35  ;;  %v655_v38 = vunpack.i.h.bf16 %v653_v35  ;;  %v176_v35 = vsel %vm160_vm2, %v933_v40, 0.0 }
 0x22e   :  { %205 = vmatpush.msra.mxu2 %v654_v36  ;;  %629 = vmatpush.msra.mxu3 %v654_v36 }
 0x230   :  { %206 = vmatpush.msra.mxu2 %v655_v38  ;;  %630 = vmatpush.msra.mxu3 %v655_v38 }
 0x231   :  { %603 = vmatmul.msk.f32.vlgmr.msra.gmra.mxu2 %vm160_vm2, %v931_v39  ;;  %604 = vmatmul.msk.f32.vlgmr.msra.gmra.mxu3 %vm160_vm2, %v933_v40 }
 0x232   :  { %605 = vmatpush.xpose.msk.msrb.mxu3 %vm128_vm1, %v225_v9  ;;  %301 = vmatpush.msrb.mxu2 %v659_v41 }
 0x233   :  { %v319_v43 = vpop.permute.xlu1 %318 }
 0x234   :  { %302 = vmatpush.msrb.mxu2 %v660_v42  ;;  %612 = vmatpush.xpose.msk.msrb.mxu0 %vm128_vm1, %v319_v43 }
 0x236   :  { %606 = vmatpush.xpose.msk.msrb.mxu3 %vm128_vm1, %v223_v10 }
 0x237   :  { %613 = vmatmul.msk.f32.vlgmr.msrb.gmra.mxu0 %vm128_vm1, %v315_v32 }
 0x239   :  { %607 = vmatmul.msk.f32.vlgmr.msrb.gmra.mxu3 %vm128_vm1, %v219_v24 }
 0x23a   :  { %617 = vmatpush.xpose.msk.msra.mxu3 %vm128_vm1, %v417_v25 }
 0x23b   :  { %v317_v44 = vpop.permute.xlu1 %316 }
 0x23e   :  { %618 = vmatpush.xpose.msk.msra.mxu3 %vm128_vm1, %v415_v13 }
 0x23f   :  { %614 = vmatmul.msk.f32.gmra.mxu0 %vm128_vm1, %v317_v44 }
 0x241   :  { %608 = vmatmul.msk.f32.gmra.mxu3 %vm128_vm1, %v913_v11 }
 0x249   :  { %619 = vmatmul.msk.f32.vlgmr.msra.gmra.mxu3 %vm128_vm1, %v411_v26 }
 0x251   :  { %620 = vmatmul.msk.f32.gmra.mxu3 %vm128_vm1, %v413_v27 }
 0x2b4   :  { %v951_v45 = vpop.f32.mrf.mxu3  ;;  %v347_v46 = vpop.f32.mrf.mxu0 }
 0x2b5   :  { %v348_v47 = vadd.f32 %v347_v46, %v920_v16  ;;  %v208_v42 = vpop.f32.mrf.mxu2 }
 0x2b7   :  { %v353_v48 = vsel %vm160_vm2, %v348_v47, -inf }
 0x2b8   :  { %354 = vmax.xlane.f32.xlu1 %v353_v48 }
 0x2bc   :  { %v251_v49 = vpop.f32.mrf.mxu3  ;;  %v350_v61 = vpop.f32.mrf.mxu0 }
 0x2bd   :  { %v252_v50 = vadd.f32 %v251_v49, %v920_v16  ;;  %v351_v62 = vadd.f32 %v350_v61, %v924_v20 }
 0x2bf   :  { %v257_v51 = vsel %vm160_vm2, %v252_v50, -inf  ;;  %v356_v63 = vsel %vm160_vm2, %v351_v62, -inf }
 0x2c0   :  { %258 = vmax.xlane.f32.xlu2 %v257_v51 }
 0x2c4   :  { %v254_v52 = vpop.f32.mrf.mxu3 }
 0x2c5   :  { %v255_v53 = vadd.f32 %v254_v52, %v924_v20 }
 0x2c7   :  { %v260_v54 = vsel %vm160_vm2, %v255_v53, -inf }
 0x2c8   :  { %261 = vmax.xlane.f32.xlu1 %v260_v54 }
 0x2cc   :  { %v443_v55 = vpop.f32.mrf.mxu3 }
 0x2cd   :  { %v444_v56 = vadd.f32 %v443_v55, %v920_v16 }
 0x2cf   :  { %v449_v57 = vsel %vm160_vm2, %v444_v56, -inf }
 0x2d0   :  { %450 = vmax.xlane.f32.xlu0 %v449_v57 }
 0x2d4   :  { %v446_v58 = vpop.f32.mrf.mxu3 }
 0x2d5   :  { %v447_v59 = vadd.f32 %v446_v58, %v924_v20 }
 0x2d7   :  { %v452_v60 = vsel %vm160_vm2, %v447_v59, -inf }
 0x2d8   :  { %667 = vrot.lane.b32.xlu2 %v910_v8, %s847_s20  ;;  %453 = vmax.xlane.f32.xlu0 %v452_v60 }
 0x2e0   :  { %357 = vmax.xlane.f32.xlu0 %v356_v63 }
 0x2e1   :  { %662 = vrot.lane.b32.xlu1 %v910_v8, %s848_s21 }
 0x32b   :  { %v355_v0 = vpop.xlane.xlu1 %354 }
 0x32c   :  { %v359_v1 = vsub.f32 %v348_v47, %v355_v0 }
 0x32e   :  { %v361_v2 = vmul.f32 1.442695, %v359_v1 }
 0x330   :  { %676 = vpow2.f32 %v361_v2 }
 0x333   :  { %v259_v3 = vpop.xlane.xlu2 %258 }
 0x334   :  { %v263_v4 = vsub.f32 %v252_v50, %v259_v3 }
 0x336   :  { %v265_v5 = vmul.f32 1.442695, %v263_v4  ;;  %v677_v6 = vpop.eup %676  ;;  %v540_v4 = vld [vmem:[#allocation7 + $0x18] sm:$0xff] }
 0x337   :  { %v365_v7 = vsel %vm160_vm2, %v677_v6, 0.0  ;;  %563 = vmatpush.msra.mxu0 %v540_v4 }
 0x338   :  { %678 = vpow2.f32 %v265_v5  ;;  %366 = vadd.xlane.f32.xlu2 %v365_v7  ;;  %v539_v5 = vld [vmem:[#allocation7 + $0x10] sm:$0xff]  ;;  %v537_v7 = vld [vmem:[#allocation7] sm:$0xff] }
 0x339   :  { %564 = vmatpush.msra.mxu0 %v539_v5 }
 0x33b   :  { %v262_v9 = vpop.xlane.xlu1 %261  ;;  %v668_v10 = vpop.permute.xlu2 %667 }
 0x33c   :  { %v264_v11 = vsub.f32 %v255_v53, %v262_v9  ;;  %v669_v12 = vunpack.i.l.bf16 %v668_v10  ;;  %v670_v15 = vunpack.i.h.bf16 %v668_v10 }
 0x33e   :  { %v679_v13 = vpop.eup %678  ;;  %v267_v14 = vmul.f32 1.442695, %v264_v11  ;;  %397 = vmatpush.msra.mxu1 %v669_v12 }
 0x33f   :  { %609 = vmatmul.msk.f32.vlgmr.msrb.gmra.mxu2 %vm160_vm2, %v679_v13  ;;  %v269_v8 = vsel %vm160_vm2, %v679_v13, 0.0 }
 0x340   :  { %680 = vpow2.f32 %v267_v14  ;;  %398 = vmatpush.msra.mxu1 %v670_v15  ;;  %270 = vadd.xlane.f32.xlu0 %v269_v8 }
 0x341   :  { %615 = vmatmul.msk.f32.vlgmr.msra.gmra.mxu1 %vm160_vm2, %v677_v6  ;;  %v538_v6 = vld [vmem:[#allocation7 + $0x8] sm:$0xff] }
 0x342   :  { %565 = vmatpush.msra.mxu0 %v538_v6 }
 0x343   :  { %v451_v16 = vpop.xlane.xlu0 %450 }
 0x344   :  { %v455_v19 = vsub.f32 %v444_v56, %v451_v16  ;;  %566 = vmatpush.msra.mxu0 %v537_v7 }
 0x346   :  { %v681_v17 = vpop.eup %680  ;;  %v457_v21 = vmul.f32 1.442695, %v455_v19 }
 0x347   :  { %610 = vmatmul.msk.f32.gmra.mxu2 %vm160_vm2, %v681_v17  ;;  %v272_v18 = vsel %vm160_vm2, %v681_v17, 0.0 }
 0x348   :  { %273 = vadd.xlane.f32.xlu1 %v272_v18  ;;  %682 = vpow2.f32 %v457_v21 }
 0x34b   :  { %v454_v20 = vpop.xlane.xlu0 %453 }
 0x34c   :  { %v456_v22 = vsub.f32 %v447_v59, %v454_v20 }
 0x34e   :  { %v459_v27 = vmul.f32 1.442695, %v456_v22  ;;  %v683_v30 = vpop.eup %682  ;;  %v671_v22 = vld [vmem:[%s1006_s3] ss:$0 sm:$0xff] }
 0x34f   :  { %v461_v36 = vsel %vm160_vm2, %v683_v30, 0.0 }
 0x353   :  { %v663_v23 = vpop.permute.xlu1 %662  ;;  %v358_v24 = vpop.xlane.xlu0 %357 }
 0x354   :  { %v664_v25 = vunpack.i.l.bf16 %v663_v23  ;;  %v360_v26 = vsub.f32 %v351_v62, %v358_v24  ;;  %v665_v28 = vunpack.i.h.bf16 %v663_v23 }
 0x356   :  { %v363_v29 = vmul.f32 1.442695, %v360_v26  ;;  %493 = vmatpush.msra.mxu2 %v664_v25 }
 0x358   :  { %684 = vpow2.f32 %v363_v29  ;;  %494 = vmatpush.msra.mxu2 %v665_v28 }
 0x359   :  { %621 = vmatmul.msk.f32.vlgmr.msra.gmra.mxu2 %vm160_vm2, %v683_v30  ;;  %686 = vpow2.f32 %v459_v27 }
 0x35e   :  { %v685_v31 = vpop.eup %684 }
 0x35f   :  { %616 = vmatmul.msk.f32.gmra.mxu1 %vm160_vm2, %v685_v31  ;;  %v368_v32 = vsel %vm160_vm2, %v685_v31, 0.0  ;;  %v687_v33 = vpop.eup %686 }
 0x360   :  { %369 = vadd.xlane.f32.xlu0 %v368_v32  ;;  %v464_v37 = vsel %vm160_vm2, %v687_v33, 0.0 }
 0x361   :  { %622 = vmatmul.msk.f32.gmra.mxu2 %vm160_vm2, %v687_v33 }
 0x368   :  { %174 = vadd.xlane.f32.xlu0 %v173_v34 }
 0x370   :  { %177 = vadd.xlane.f32.xlu0 %v176_v35 }
 0x378   :  { %462 = vadd.xlane.f32.xlu0 %v461_v36 }
 0x380   :  { %465 = vadd.xlane.f32.xlu0 %v464_v37 }
 0x3ab   :  { %v367_v38 = vpop.xlane.xlu2 %366 }
 0x3ac   :  { %688 = vrcp.f32 %v367_v38 }
 0x3b2   :  { %v689_v43 = vpop.eup %688 }
 0x3b3   :  { %v271_v41 = vpop.xlane.xlu0 %270 }
 0x3b4   :  { %690 = vrcp.f32 %v271_v41 }
 0x3ba   :  { %v691_v47 = vpop.eup %690 }
 0x3bb   :  { %v274_v39 = vpop.xlane.xlu1 %273 }
 0x3bc   :  { %692 = vrcp.f32 %v274_v39 }
 0x3be   :  { %v400_v44 = vpop.f32.mrf.mxu1 }
 0x3bf   :  { %v408_v46 = vmul.f32 %v689_v43, %v400_v44 }
 0x3c1   :  { %516 = vrot.lane.b32.xlu2 %v408_v46, %s849_s22 }
 0x3c2   :  { %v304_v40 = vpop.f32.mrf.mxu2  ;;  %v693_v49 = vpop.eup %692 }
 0x3c3   :  { %v312_v48 = vmul.f32 %v691_v47, %v304_v40 }
 0x3c5   :  { %508 = vrot.lane.b32.xlu0 %v312_v48, %s834_s27 }
 0x3ca   :  { %v307_v50 = vpop.f32.mrf.mxu2 }
 0x3cb   :  { %v313_v51 = vmul.f32 %v693_v49, %v307_v50 }
 0x3cd   :  { %510 = vrot.lane.b32.xlu0 %v313_v51, %s834_s27 }
 0x3d3   :  { %v370_v52 = vpop.xlane.xlu0 %369 }
 0x3d4   :  { %694 = vrcp.f32 %v370_v52 }
 0x3da   :  { %v695_v54 = vpop.eup %694 }
 0x3db   :  { %v175_v53 = vpop.xlane.xlu0 %174 }
 0x3dc   :  { %696 = vrcp.f32 %v175_v53  ;;  %v403_v55 = vpop.f32.mrf.mxu1  ;;  %v496_v61 = vpop.f32.mrf.mxu2 }
 0x3dd   :  { %v409_v56 = vmul.f32 %v695_v54, %v403_v55 }
 0x3df   :  { %518 = vrot.lane.b32.xlu2 %v409_v56, %s849_s22 }
 0x3e2   :  { %v697_v57 = vpop.eup %696 }
 0x3e3   :  { %v178_v58 = vpop.xlane.xlu0 %177  ;;  %v216_v59 = vmul.f32 %v697_v57, %v208_v42 }
 0x3e4   :  { %v499_v2 = vpop.f32.mrf.mxu2 }
 0x3eb   :  { %v463_v60 = vpop.xlane.xlu0 %462 }
 0x3ec   :  { %698 = vrcp.f32 %v463_v60 }
 0x3f2   :  { %v699_v62 = vpop.eup %698 }
 0x3f3   :  { %v466_v63 = vpop.xlane.xlu0 %465  ;;  %v504_v0 = vmul.f32 %v699_v62, %v496_v61 }
 0x3f4   :  { %700 = vrcp.f32 %v466_v63 }
 0x3f5   :  { %524 = vrot.lane.b32.xlu1 %v504_v0, %s850_s23  ;;  %702 = vrcp.f32 %v178_v58 }
 0x3fa   :  { %v701_v1 = vpop.eup %700 }
 0x3fb   :  { %v505_v3 = vmul.f32 %v701_v1, %v499_v2  ;;  %v703_v12 = vpop.eup %702 }
 0x3fc   :  { %v217_v16 = vmul.f32 %v703_v12, %v951_v45 }
 0x3fd   :  { %526 = vrot.lane.b32.xlu0 %v505_v3, %s850_s23 }
 0x41b   :  { %v517_v11 = vpop.permute.xlu2 %516 }
 0x437   :  { %v509_v9 = vpop.permute.xlu0 %508 }
 0x438   :  { %v530_v10 = vsel %vm128_vm1, %v216_v59, %v509_v9 }
 0x439   :  { %v532_v15 = vsel %vm160_vm2, %v530_v10, %v517_v11  ;;  %v519_v18 = vpop.permute.xlu2 %518 }
 0x43f   :  { %v511_v13 = vpop.permute.xlu0 %510 }
 0x440   :  { %v531_v17 = vsel %vm128_vm1, %v217_v16, %v511_v13 }
 0x441   :  { %v533_v20 = vsel %vm160_vm2, %v531_v17, %v519_v18 }
 0x467   :  { %v525_v14 = vpop.permute.xlu1 %524 }
 0x468   :  { %v535_v8 = vsel %vm534_vm3, %v532_v15, %v525_v14 }
 0x469   :  { %623 = vmatmul.msk.f32.vlgmr.msra.gmra.mxu0 %vm92_vm0, %v535_v8 }
 0x46f   :  { %v527_v19 = vpop.permute.xlu0 %526 }
 0x470   :  { %v536_v21 = vsel %vm534_vm3, %v533_v20, %v527_v19 }
 0x471   :  { %624 = vmatmul.msk.f32.gmra.mxu0 %vm92_vm0, %v536_v21 }
 0x4e6   :  { %v568_v23 = vpop.f32.mrf.mxu0 }
 0x4e7   :  { %v569_v24 = vadd.f32 %v671_v22, %v568_v23 }
 0x4e9   :  { %574 = vst.msk [vmem:[#allocation10] sm:$0xff] %vm92_vm0, %v569_v24 }
 0x4ee   :  { %v571_v45 = vpop.f32.mrf.mxu0 }
 0x4ef   :  { %v572_v25 = vadd.f32 %v671_v22, %v571_v45 }
 0x4f1   :  { %575 = vst.msk [vmem:[#allocation10 + $0x8] sm:$0xff] %vm92_vm0, %v572_v25 }
 0x4f2   :  { %588 = dma.vmem_to_hbm [thread:$0]  %s581_s29, 256, %s583_s1, [#allocation4], %s833_s26, %s833_s26, %s834_s27  }
 0x4f3   :  { %830 = dma.done.wait [#allocation4], 256  }
 0x4f4   :  { %831 = vsyncadd [#allocation4], 4294967040 }
 0x4f5   :  { %593 = vsyncpa [#allocation3], 1 }
 0x4f6   :  { %594 = vsyncpa [#allocation6], 1 }
 0x4f7   :  { %595 = vsyncpa [#allocation9], 1 }
 0x4f8   :  { %596 = vsyncpa [#allocation4], 1 }

</bundles_post_ra>
